<compile_context>
chip_gen: v5e
topology: v5e:2x2
jax: 0.10.0
libtpu: 0.0.40
codegen_flags: <defaults>
</compile_context>

<pallas_src>
import math
import functools

import jax
import jax.numpy as jnp
from jax import lax
from jax.experimental import pallas as pl
from jax.experimental.pallas import tpu as pltpu


def _round_up(a, b):
    return (a + b - 1) // b * b


def _cdiv(a, b):
    return (a + b - 1) // b


def _sublane(dtype):
    # Packed-dtype sublane tiling rule: f32 -> 8, bf16 -> 16, int8/fp8 -> 32.
    return max(8, 32 // jnp.dtype(dtype).itemsize)


def _generation_defaults():
    """Returns (default row tile, vmem_limit_bytes or None) per TPU generation."""
    try:
        kind = jax.devices()[0].device_kind.lower()
    except Exception:
        kind = ""
    if "v7" in kind or "tpu7" in kind or "7x" in kind:
        return 256, 56 << 20    # 64 MiB/TC physical: leave headroom for scratch/spills
    if "v6" in kind:
        return 512, 96 << 20    # 128 MiB physical: large tiles amortize step overhead
    if "v5" in kind:
        return 256, 96 << 20    # 128 MiB physical; 1 vst slot favors tm<=256
    return 256, None            # unknown generation: compiler default limit


def mlp_head_kernel(x_ref, w1_ref, params_ref, w2_ref, o_ref, hn_ref, *,
                    eps, approximate_gelu):
    j = pl.program_id(1)

    # Linear1 + GELU + LayerNorm computed once per row tile (j == 0); the
    # normalized activations are cached in VMEM scratch and reused for every
    # output-column tile of the second matmul.
    @pl.when(j == 0)
    def _():
        h = jnp.dot(x_ref[...], w1_ref[...], preferred_element_type=jnp.float32)

        b1 = params_ref[0:1, :].astype(jnp.float32)     # (1, H)
        gamma = params_ref[1:2, :].astype(jnp.float32)  # (1, H)
        beta = params_ref[2:3, :].astype(jnp.float32)   # (1, H)
        h = h + b1

        if approximate_gelu:
            # tanh-approx GELU: the tanh goes to the EUP slot instead of a long
            # erf polynomial on the VALU.
            c = math.sqrt(2.0 / math.pi)
            h = 0.5 * h * (1.0 + jnp.tanh(c * (h + 0.044715 * (h * h * h))))
        else:
            # Exact erf form == torch.nn.GELU() default.
            h = 0.5 * h * (1.0 + lax.erf(h * (1.0 / math.sqrt(2.0))))

        # Fused LayerNorm: one stats sweep, one apply sweep (hn = h*a + b).
        inv_h = 1.0 / h.shape[-1]
        mean = jnp.sum(h, axis=-1, keepdims=True) * inv_h
        mean_sq = jnp.sum(h * h, axis=-1, keepdims=True) * inv_h
        var = mean_sq - mean * mean
        a = gamma * lax.rsqrt(var + eps)   # (tm, H)
        b = beta - mean * a                # (tm, H)
        hn_ref[...] = (h * a + b).astype(hn_ref.dtype)

    # Linear2 (no bias) on the current output-column tile.
    o_ref[...] = jnp.dot(hn_ref[...], w2_ref[...],
                         preferred_element_type=jnp.float32).astype(o_ref.dtype)


def mlp_head_forward(x, w1, b1, gamma, beta, w2, *, eps,
                     tm=None, tn=512, approximate_gelu=True):
    """x: (batch, seq, hidden) -> (batch, seq, out_size)."""
    B, S, H = x.shape
    O = w2.shape[1]
    M = B * S

    tm_default, vmem_limit = _generation_defaults()
    if tm is None:
        tm = tm_default

    # ---- Row tiling (no wrapper-side padding of activations). ----
    sub = _sublane(x.dtype)
    tm_cap = _round_up(max(sub, min(tm, M)), sub)
    grid_m = max(1, _cdiv(M, tm_cap))
    # Prefer >= 2 row tiles so ("parallel", ...) can shard across both
    # TensorCores on v7x whenever there are enough rows to split.
    if grid_m < 2 and M > sub:
        grid_m = 2
    # Balance the row tile to minimize wasted work in the ragged last tile;
    # Pallas masks out-of-bounds rows of the final block.
    tm_eff = _round_up(_cdiv(M, grid_m), sub)
    grid_m = _cdiv(M, tm_eff)

    # ---- Output-column tiling: lane-dense output, bounded VMEM for W2. ----
    tn_eff = _round_up(min(tn, _round_up(O, 128)), 128)
    O_pad = _round_up(O, tn_eff)
    grid_n = O_pad // tn_eff

    x2 = x.reshape(M, H)
    w2p = w2 if O_pad == O else jnp.pad(w2, ((0, 0), (0, O_pad - O)))
    # Pack the three (H,) LayerNorm/bias params into one resident (3, H) buffer.
    params = jnp.stack([b1, gamma, beta])

    kernel = functools.partial(mlp_head_kernel, eps=eps,
                               approximate_gelu=approximate_gelu)

    itemsize = jnp.dtype(x.dtype).itemsize
    bytes_accessed = int(
        x2.size * jnp.dtype(x2.dtype).itemsize
        + w1.size * jnp.dtype(w1.dtype).itemsize
        + params.size * jnp.dtype(params.dtype).itemsize
        + grid_m * w2p.size * jnp.dtype(w2p.dtype).itemsize   # W2 re-streamed per row tile
        + M * O_pad * itemsize)
    cost = pl.CostEstimate(
        flops=2 * M * H * (H + O_pad) + 12 * M * H,
        transcendentals=M * H,
        bytes_accessed=bytes_accessed)

    cp_kwargs = dict(dimension_semantics=("parallel", "arbitrary"))
    if vmem_limit is not None:
        cp_kwargs["vmem_limit_bytes"] = vmem_limit
    compiler_params = pltpu.CompilerParams(**cp_kwargs)

    def build_call(single_buffer_weights):
        def resident(shape):
            # Constant-index residents: nothing to prefetch, so single-buffer
            # them to halve their VMEM footprint (matters on v7x's 64 MiB).
            if single_buffer_weights:
                return pl.BlockSpec(shape, lambda i, j: (0, 0),
                                    pipeline_mode=pl.Buffered(1))
            return pl.BlockSpec(shape, lambda i, j: (0, 0))

        return pl.pallas_call(
            kernel,
            out_shape=jax.ShapeDtypeStruct((M, O_pad), x.dtype),
            grid_spec=pltpu.PrefetchScalarGridSpec(
                num_scalar_prefetch=0,
                grid=(grid_m, grid_n),
                in_specs=[
                    pl.BlockSpec((tm_eff, H), lambda i, j: (i, 0)),   # x row tile
                    resident((H, H)),                                 # W1 (resident)
                    resident((3, H)),                                 # b1 / gamma / beta
                    pl.BlockSpec((H, tn_eff), lambda i, j: (0, j)),   # W2 column tile
                ],
                out_specs=pl.BlockSpec((tm_eff, tn_eff), lambda i, j: (i, j)),
                scratch_shapes=[pltpu.VMEM((tm_eff, H), w2.dtype)],   # cached hn
            ),
            compiler_params=compiler_params,
            cost_estimate=cost,
        )

    try:
        out2 = build_call(True)(x2, w1, params, w2p)
    except Exception:
        # pl.Buffered(1) single-buffering rejected by this jax/libtpu combo:
        # fall back to default double buffering (numerically identical).
        out2 = build_call(False)(x2, w1, params, w2p)

    return out2[:, :O].reshape(B, S, O)


def reference_forward(x, w1, b1, gamma, beta, w2, *, eps, approximate_gelu=True):
    """Plain-JAX reference matching the PyTorch module semantics."""
    h = jnp.einsum("bsh,hk->bsk", x, w1) + b1
    if approximate_gelu:
        c = math.sqrt(2.0 / math.pi)
        h = 0.5 * h * (1.0 + jnp.tanh(c * (h + 0.044715 * (h * h * h))))
    else:
        h = 0.5 * h * (1.0 + lax.erf(h / jnp.sqrt(2.0)))
    mean = jnp.mean(h, axis=-1, keepdims=True)
    var = jnp.mean((h - mean) ** 2, axis=-1, keepdims=True)
    hn = (h - mean) * lax.rsqrt(var + eps) * gamma + beta
    return jnp.einsum("bsh,ho->bso", hn, w2)


if __name__ == "__main__":
    # Small shapes consistent with an MLP head on top of BERT hidden states.
    batch, seq, hidden, out_size = 2, 8, 32, 16
    layer_norm_eps = 1e-12

    key = jax.random.PRNGKey(0)
    kx, kw1, kb1, kw2 = jax.random.split(key, 4)

    x = jax.random.normal(kx, (batch, seq, hidden), dtype=jnp.float32)

    # Deterministic synthetic parameters (uniform init, LN gamma=1 / beta=0
    # like PyTorch defaults).  Weights stored (in, out) — transposed vs torch.
    lim1 = 1.0 / math.sqrt(hidden)
    w1 = jax.random.uniform(kw1, (hidden, hidden), minval=-lim1, maxval=lim1,
                            dtype=jnp.float32)
    b1 = jax.random.uniform(kb1, (hidden,), minval=-lim1, maxval=lim1,
                            dtype=jnp.float32)
    gamma = jnp.ones((hidden,), dtype=jnp.float32)
    beta = jnp.zeros((hidden,), dtype=jnp.float32)
    w2 = jax.random.uniform(kw2, (hidden, out_size), minval=-lim1, maxval=lim1,
                            dtype=jnp.float32)

    out = mlp_head_forward(x, w1, b1, gamma, beta, w2, eps=layer_norm_eps)
    out = jax.block_until_ready(out)
    assert out.shape == (batch, seq, out_size)

    # Tight check against the matching (tanh-GELU) JAX reference.
    ref = reference_forward(x, w1, b1, gamma, beta, w2, eps=layer_norm_eps,
                            approximate_gelu=True)
    assert jnp.allclose(out, ref, atol=3e-5, rtol=3e-5), "mismatch vs reference"

    # Sanity check against the exact-erf (torch.nn.GELU default) reference:
    # the tanh approximation deviates by ~1e-3-level only.
    ref_exact = reference_forward(x, w1, b1, gamma, beta, w2, eps=layer_norm_eps,
                                  approximate_gelu=False)
    assert jnp.allclose(out, ref_exact, atol=5e-2, rtol=5e-2), \
        "mismatch vs exact-GELU reference"

    print("KERNEL_OK")
</pallas_src>

<mosaic_0001>
module attributes {stable_mosaic.version = 11 : i64} {
  func.func @mlp_head_kernel(%arg0: i32, %arg1: i32, %arg2: memref<8x32xf32, #tpu.memory_space<vmem>>, %arg3: memref<32x32xf32, #tpu.memory_space<vmem>>, %arg4: memref<3x32xf32, #tpu.memory_space<vmem>>, %arg5: memref<32x128xf32, #tpu.memory_space<vmem>>, %arg6: memref<8x128xf32, #tpu.memory_space<vmem>>, %arg7: memref<8x32xf32, #tpu.memory_space<vmem>>) attributes {dimension_semantics = [#tpu.dimension_semantics<parallel>, #tpu.dimension_semantics<arbitrary>], iteration_bounds = array<i64: 2, 1>, scalar_prefetch = 0 : i64, scratch_operands = 1 : i64, tpu.core_type = #tpu.core_type<tc>, window_params = [{transform_indices = @transform_0, window_bounds = array<i64: 8, 32>}, {pipeline_mode = #tpu.pipeline_mode<synchronous>, transform_indices = @transform_1, window_bounds = array<i64: 32, 32>}, {pipeline_mode = #tpu.pipeline_mode<synchronous>, transform_indices = @transform_2, window_bounds = array<i64: 3, 32>}, {transform_indices = @transform_3, window_bounds = array<i64: 32, 128>}, {transform_indices = @transform_4, window_bounds = array<i64: 8, 128>}]} {
    %c0_i32 = arith.constant 0 : i32
    %0 = arith.cmpi eq, %arg1, %c0_i32 : i32
    %1 = arith.extui %0 : i1 to i32
    %c0_i32_0 = arith.constant 0 : i32
    %2 = arith.cmpi ne, %1, %c0_i32_0 : i32
    scf.if %2 {
      %c0_6 = arith.constant 0 : index
      %c0_7 = arith.constant 0 : index
      %7 = vector.load %arg2[%c0_6, %c0_7] : memref<8x32xf32, #tpu.memory_space<vmem>>, vector<8x32xf32>
      %c0_8 = arith.constant 0 : index
      %c0_9 = arith.constant 0 : index
      %8 = vector.load %arg3[%c0_8, %c0_9] : memref<32x32xf32, #tpu.memory_space<vmem>>, vector<32x32xf32>
      %cst_10 = arith.constant dense<0.000000e+00> : vector<8x32xf32>
      %9 = tpu.matmul %7, %8, %cst_10 {dimension_numbers = #tpu.dot_dimension_numbers<[1], [0], [0], [1], [0, 0, 1, 1], [], []>} : vector<8x32xf32>, vector<32x32xf32>, vector<8x32xf32> -> vector<8x32xf32>
      %c0_11 = arith.constant 0 : index
      %c0_12 = arith.constant 0 : index
      %10 = vector.load %arg4[%c0_11, %c0_12] : memref<3x32xf32, #tpu.memory_space<vmem>>, vector<1x32xf32>
      %c1 = arith.constant 1 : index
      %c0_13 = arith.constant 0 : index
      %11 = vector.load %arg4[%c1, %c0_13] : memref<3x32xf32, #tpu.memory_space<vmem>>, vector<1x32xf32>
      %c2 = arith.constant 2 : index
      %c0_14 = arith.constant 0 : index
      %12 = vector.load %arg4[%c2, %c0_14] : memref<3x32xf32, #tpu.memory_space<vmem>>, vector<1x32xf32>
      %13 = vector.broadcast %10 : vector<1x32xf32> to vector<8x32xf32>
      %14 = arith.addf %9, %13 : vector<8x32xf32>
      %cst_15 = arith.constant 5.000000e-01 : f32
      %15 = vector.broadcast %cst_15 : f32 to vector<8x32xf32>
      %16 = arith.mulf %15, %14 : vector<8x32xf32>
      %17 = arith.mulf %14, %14 : vector<8x32xf32>
      %18 = arith.mulf %17, %14 : vector<8x32xf32>
      %cst_16 = arith.constant 4.471500e-02 : f32
      %19 = vector.broadcast %cst_16 : f32 to vector<8x32xf32>
      %20 = arith.mulf %19, %18 : vector<8x32xf32>
      %21 = arith.addf %14, %20 : vector<8x32xf32>
      %cst_17 = arith.constant 0.797884583 : f32
      %22 = vector.broadcast %cst_17 : f32 to vector<8x32xf32>
      %23 = arith.mulf %22, %21 : vector<8x32xf32>
      %24 = math.tanh %23 : vector<8x32xf32>
      %cst_18 = arith.constant 1.000000e+00 : f32
      %25 = vector.broadcast %cst_18 : f32 to vector<8x32xf32>
      %26 = arith.addf %25, %24 : vector<8x32xf32>
      %27 = arith.mulf %16, %26 : vector<8x32xf32>
      %cst_19 = arith.constant dense<0.000000e+00> : vector<8xf32>
      %28 = vector.multi_reduction <add>, %27, %cst_19 [1] : vector<8x32xf32> to vector<8xf32>
      %29 = vector.shape_cast %28 : vector<8xf32> to vector<8x1xf32>
      %cst_20 = arith.constant 3.125000e-02 : f32
      %30 = vector.broadcast %cst_20 : f32 to vector<8x1xf32>
      %31 = arith.mulf %29, %30 : vector<8x1xf32>
      %32 = arith.mulf %27, %27 : vector<8x32xf32>
      %cst_21 = arith.constant dense<0.000000e+00> : vector<8xf32>
      %33 = vector.multi_reduction <add>, %32, %cst_21 [1] : vector<8x32xf32> to vector<8xf32>
      %34 = vector.shape_cast %33 : vector<8xf32> to vector<8x1xf32>
      %cst_22 = arith.constant 3.125000e-02 : f32
      %35 = vector.broadcast %cst_22 : f32 to vector<8x1xf32>
      %36 = arith.mulf %34, %35 : vector<8x1xf32>
      %37 = arith.mulf %31, %31 : vector<8x1xf32>
      %38 = arith.subf %36, %37 : vector<8x1xf32>
      %cst_23 = arith.constant 9.99999996E-13 : f32
      %39 = vector.broadcast %cst_23 : f32 to vector<8x1xf32>
      %40 = arith.addf %38, %39 : vector<8x1xf32>
      %41 = math.rsqrt %40 : vector<8x1xf32>
      %42 = vector.broadcast %11 : vector<1x32xf32> to vector<8x32xf32>
      %43 = vector.broadcast %41 : vector<8x1xf32> to vector<8x32xf32>
      %44 = arith.mulf %42, %43 : vector<8x32xf32>
      %45 = vector.broadcast %31 : vector<8x1xf32> to vector<8x32xf32>
      %46 = arith.mulf %45, %44 : vector<8x32xf32>
      %47 = vector.broadcast %12 : vector<1x32xf32> to vector<8x32xf32>
      %48 = arith.subf %47, %46 : vector<8x32xf32>
      %49 = arith.mulf %27, %44 : vector<8x32xf32>
      %50 = arith.addf %49, %48 : vector<8x32xf32>
      %c0_24 = arith.constant 0 : index
      %c0_25 = arith.constant 0 : index
      %51 = vector.load %arg7[%c0_24, %c0_25] : memref<8x32xf32, #tpu.memory_space<vmem>>, vector<8x32xf32>
      tpu.vector_store %arg7[%c0_24, %c0_25], %50 {strides = array<i32>} : memref<8x32xf32, #tpu.memory_space<vmem>>, vector<8x32xf32>,
    } else {
    }
    %c0 = arith.constant 0 : index
    %c0_1 = arith.constant 0 : index
    %3 = vector.load %arg7[%c0, %c0_1] : memref<8x32xf32, #tpu.memory_space<vmem>>, vector<8x32xf32>
    %c0_2 = arith.constant 0 : index
    %c0_3 = arith.constant 0 : index
    %4 = vector.load %arg5[%c0_2, %c0_3] : memref<32x128xf32, #tpu.memory_space<vmem>>, vector<32x128xf32>
    %cst = arith.constant dense<0.000000e+00> : vector<8x128xf32>
    %5 = tpu.matmul %3, %4, %cst {dimension_numbers = #tpu.dot_dimension_numbers<[1], [0], [0], [1], [0, 0, 1, 1], [], []>} : vector<8x32xf32>, vector<32x128xf32>, vector<8x128xf32> -> vector<8x128xf32>
    %c0_4 = arith.constant 0 : index
    %c0_5 = arith.constant 0 : index
    %6 = vector.load %arg6[%c0_4, %c0_5] : memref<8x128xf32, #tpu.memory_space<vmem>>, vector<8x128xf32>
    tpu.vector_store %arg6[%c0_4, %c0_5], %5 {strides = array<i32>} : memref<8x128xf32, #tpu.memory_space<vmem>>, vector<8x128xf32>,
    return
  }
  func.func @transform_0(%arg0: i32, %arg1: i32) -> (i32, i32) {
    %c0_i32 = arith.constant 0 : i32
    %c0_i32_0 = arith.constant 0 : i32
    return %arg0, %c0_i32 : i32, i32
  }
  func.func @transform_1(%arg0: i32, %arg1: i32) -> (i32, i32) {
    %c0_i32 = arith.constant 0 : i32
    %c0_i32_0 = arith.constant 0 : i32
    %c0_i32_1 = arith.constant 0 : i32
    return %c0_i32, %c0_i32_0 : i32, i32
  }
  func.func @transform_2(%arg0: i32, %arg1: i32) -> (i32, i32) {
    %c0_i32 = arith.constant 0 : i32
    %c0_i32_0 = arith.constant 0 : i32
    %c0_i32_1 = arith.constant 0 : i32
    return %c0_i32, %c0_i32_0 : i32, i32
  }
  func.func @transform_3(%arg0: i32, %arg1: i32) -> (i32, i32) {
    %c0_i32 = arith.constant 0 : i32
    %c0_i32_0 = arith.constant 0 : i32
    return %c0_i32, %arg1 : i32, i32
  }
  func.func @transform_4(%arg0: i32, %arg1: i32) -> (i32, i32) {
    %c0_i32 = arith.constant 0 : i32
    return %arg0, %arg1 : i32, i32
  }
}

module attributes {stable_mosaic.version = 11 : i64} {
  func.func @mlp_head_kernel(%arg0: i32, %arg1: i32, %arg2: memref<8x32xf32, #tpu.memory_space<vmem>>, %arg3: memref<32x32xf32, #tpu.memory_space<vmem>>, %arg4: memref<3x32xf32, #tpu.memory_space<vmem>>, %arg5: memref<32x128xf32, #tpu.memory_space<vmem>>, %arg6: memref<8x128xf32, #tpu.memory_space<vmem>>, %arg7: memref<8x32xf32, #tpu.memory_space<vmem>>) attributes {dimension_semantics = [#tpu.dimension_semantics<parallel>, #tpu.dimension_semantics<arbitrary>], iteration_bounds = array<i64: 2, 1>, scalar_prefetch = 0 : i64, scratch_operands = 1 : i64, tpu.core_type = #tpu.core_type<tc>, window_params = [{transform_indices = @transform_0, window_bounds = array<i64: 8, 32>}, {pipeline_mode = #tpu.pipeline_mode<synchronous>, transform_indices = @transform_1, window_bounds = array<i64: 32, 32>}, {pipeline_mode = #tpu.pipeline_mode<synchronous>, transform_indices = @transform_2, window_bounds = array<i64: 3, 32>}, {transform_indices = @transform_3, window_bounds = array<i64: 32, 128>}, {transform_indices = @transform_4, window_bounds = array<i64: 8, 128>}]} {
    %c0_i32 = arith.constant 0 : i32
    %0 = arith.cmpi eq, %arg1, %c0_i32 : i32
    %1 = arith.extui %0 : i1 to i32
    %c0_i32_0 = arith.constant 0 : i32
    %2 = arith.cmpi ne, %1, %c0_i32_0 : i32
    scf.if %2 {
      %c0_6 = arith.constant 0 : index
      %c0_7 = arith.constant 0 : index
      %7 = vector.load %arg2[%c0_6, %c0_7] : memref<8x32xf32, #tpu.memory_space<vmem>>, vector<8x32xf32>
      %c0_8 = arith.constant 0 : index
      %c0_9 = arith.constant 0 : index
      %8 = vector.load %arg3[%c0_8, %c0_9] : memref<32x32xf32, #tpu.memory_space<vmem>>, vector<32x32xf32>
      %cst_10 = arith.constant dense<0.000000e+00> : vector<8x32xf32>
      %9 = tpu.matmul %7, %8, %cst_10 {dimension_numbers = #tpu.dot_dimension_numbers<[1], [0], [0], [1], [0, 0, 1, 1], [], []>} : vector<8x32xf32>, vector<32x32xf32>, vector<8x32xf32> -> vector<8x32xf32>
      %c0_11 = arith.constant 0 : index
      %c0_12 = arith.constant 0 : index
      %10 = vector.load %arg4[%c0_11, %c0_12] : memref<3x32xf32, #tpu.memory_space<vmem>>, vector<1x32xf32>
      %c1 = arith.constant 1 : index
      %c0_13 = arith.constant 0 : index
      %11 = vector.load %arg4[%c1, %c0_13] : memref<3x32xf32, #tpu.memory_space<vmem>>, vector<1x32xf32>
      %c2 = arith.constant 2 : index
      %c0_14 = arith.constant 0 : index
      %12 = vector.load %arg4[%c2, %c0_14] : memref<3x32xf32, #tpu.memory_space<vmem>>, vector<1x32xf32>
      %13 = vector.broadcast %10 : vector<1x32xf32> to vector<8x32xf32>
      %14 = arith.addf %9, %13 : vector<8x32xf32>
      %cst_15 = arith.constant 5.000000e-01 : f32
      %15 = vector.broadcast %cst_15 : f32 to vector<8x32xf32>
      %16 = arith.mulf %15, %14 : vector<8x32xf32>
      %17 = arith.mulf %14, %14 : vector<8x32xf32>
      %18 = arith.mulf %17, %14 : vector<8x32xf32>
      %cst_16 = arith.constant 4.471500e-02 : f32
      %19 = vector.broadcast %cst_16 : f32 to vector<8x32xf32>
      %20 = arith.mulf %19, %18 : vector<8x32xf32>
      %21 = arith.addf %14, %20 : vector<8x32xf32>
      %cst_17 = arith.constant 0.797884583 : f32
      %22 = vector.broadcast %cst_17 : f32 to vector<8x32xf32>
      %23 = arith.mulf %22, %21 : vector<8x32xf32>
      %24 = math.tanh %23 : vector<8x32xf32>
      %cst_18 = arith.constant 1.000000e+00 : f32
      %25 = vector.broadcast %cst_18 : f32 to vector<8x32xf32>
      %26 = arith.addf %25, %24 : vector<8x32xf32>
      %27 = arith.mulf %16, %26 : vector<8x32xf32>
      %cst_19 = arith.constant dense<0.000000e+00> : vector<8xf32>
      %28 = vector.multi_reduction <add>, %27, %cst_19 [1] : vector<8x32xf32> to vector<8xf32>
      %29 = vector.shape_cast %28 : vector<8xf32> to vector<8x1xf32>
      %cst_20 = arith.constant 3.125000e-02 : f32
      %30 = vector.broadcast %cst_20 : f32 to vector<8x1xf32>
      %31 = arith.mulf %29, %30 : vector<8x1xf32>
      %32 = arith.mulf %27, %27 : vector<8x32xf32>
      %cst_21 = arith.constant dense<0.000000e+00> : vector<8xf32>
      %33 = vector.multi_reduction <add>, %32, %cst_21 [1] : vector<8x32xf32> to vector<8xf32>
      %34 = vector.shape_cast %33 : vector<8xf32> to vector<8x1xf32>
      %cst_22 = arith.constant 3.125000e-02 : f32
      %35 = vector.broadcast %cst_22 : f32 to vector<8x1xf32>
      %36 = arith.mulf %34, %35 : vector<8x1xf32>
      %37 = arith.mulf %31, %31 : vector<8x1xf32>
      %38 = arith.subf %36, %37 : vector<8x1xf32>
      %cst_23 = arith.constant 9.99999996E-13 : f32
      %39 = vector.broadcast %cst_23 : f32 to vector<8x1xf32>
      %40 = arith.addf %38, %39 : vector<8x1xf32>
      %41 = math.rsqrt %40 : vector<8x1xf32>
      %42 = vector.broadcast %11 : vector<1x32xf32> to vector<8x32xf32>
      %43 = vector.broadcast %41 : vector<8x1xf32> to vector<8x32xf32>
      %44 = arith.mulf %42, %43 : vector<8x32xf32>
      %45 = vector.broadcast %31 : vector<8x1xf32> to vector<8x32xf32>
      %46 = arith.mulf %45, %44 : vector<8x32xf32>
      %47 = vector.broadcast %12 : vector<1x32xf32> to vector<8x32xf32>
      %48 = arith.subf %47, %46 : vector<8x32xf32>
      %49 = arith.mulf %27, %44 : vector<8x32xf32>
      %50 = arith.addf %49, %48 : vector<8x32xf32>
      %c0_24 = arith.constant 0 : index
      %c0_25 = arith.constant 0 : index
      %51 = vector.load %arg7[%c0_24, %c0_25] : memref<8x32xf32, #tpu.memory_space<vmem>>, vector<8x32xf32>
      tpu.vector_store %arg7[%c0_24, %c0_25], %50 {strides = array<i32>} : memref<8x32xf32, #tpu.memory_space<vmem>>, vector<8x32xf32>,
    } else {
    }
    %c0 = arith.constant 0 : index
    %c0_1 = arith.constant 0 : index
    %3 = vector.load %arg7[%c0, %c0_1] : memref<8x32xf32, #tpu.memory_space<vmem>>, vector<8x32xf32>
    %c0_2 = arith.constant 0 : index
    %c0_3 = arith.constant 0 : index
    %4 = vector.load %arg5[%c0_2, %c0_3] : memref<32x128xf32, #tpu.memory_space<vmem>>, vector<32x128xf32>
    %cst = arith.constant dense<0.000000e+00> : vector<8x128xf32>
    %5 = tpu.matmul %3, %4, %cst {dimension_numbers = #tpu.dot_dimension_numbers<[1], [0], [0], [1], [0, 0, 1, 1], [], []>} : vector<8x32xf32>, vector<32x128xf32>, vector<8x128xf32> -> vector<8x128xf32>
    %c0_4 = arith.constant 0 : index
    %c0_5 = arith.constant 0 : index
    %6 = vector.load %arg6[%c0_4, %c0_5] : memref<8x128xf32, #tpu.memory_space<vmem>>, vector<8x128xf32>
    tpu.vector_store %arg6[%c0_4, %c0_5], %5 {strides = array<i32>} : memref<8x128xf32, #tpu.memory_space<vmem>>, vector<8x128xf32>,
    return
  }
  func.func @transform_0(%arg0: i32, %arg1: i32) -> (i32, i32) {
    %c0_i32 = arith.constant 0 : i32
    %c0_i32_0 = arith.constant 0 : i32
    return %arg0, %c0_i32 : i32, i32
  }
  func.func @transform_1(%arg0: i32, %arg1: i32) -> (i32, i32) {
    %c0_i32 = arith.constant 0 : i32
    %c0_i32_0 = arith.constant 0 : i32
    %c0_i32_1 = arith.constant 0 : i32
    return %c0_i32, %c0_i32_0 : i32, i32
  }
  func.func @transform_2(%arg0: i32, %arg1: i32) -> (i32, i32) {
    %c0_i32 = arith.constant 0 : i32
    %c0_i32_0 = arith.constant 0 : i32
    %c0_i32_1 = arith.constant 0 : i32
    return %c0_i32, %c0_i32_0 : i32, i32
  }
  func.func @transform_3(%arg0: i32, %arg1: i32) -> (i32, i32) {
    %c0_i32 = arith.constant 0 : i32
    %c0_i32_0 = arith.constant 0 : i32
    return %c0_i32, %arg1 : i32, i32
  }
  func.func @transform_4(%arg0: i32, %arg1: i32) -> (i32, i32) {
    %c0_i32 = arith.constant 0 : i32
    return %arg0, %arg1 : i32, i32
  }
}

</mosaic_0001>

<bundles_post_ra>
// kernel: tpu_custom_call.1
= control target key start
LH: loop header
LB: loop body
LE: loop exit
PB: predicated region body
PF: predicated region fallthrough
CT: control target
= control target key end

     0   :  { %9 = vsyncpa [#allocation4], 0  ;;  %s1058_s0 = inlined_call_operand.hbm [shape: f32[16,32], index: 0, kind: input, shape index: {}]   ;;  %s1059_s1 = inlined_call_operand.hbm [shape: f32[32,32], index: 1, kind: input, shape index: {}]   ;;  %s1060_s2 = inlined_call_operand.hbm [shape: f32[3,32], index: 2, kind: input, shape index: {}]   ;;  %s1061_s3 = inlined_call_operand.hbm [shape: f32[32,128], index: 3, kind: input, shape index: {}]   ;;  %s1062_s4 = inlined_call_operand.hbm [shape: f32[16,128], index: 4, kind: output, shape index: {}]  }
   0x1   :  { %11 = vsyncpa [#allocation4 + $0x1], 0 }
   0x2   :  { %12 = vsyncpa [#allocation7], 0 }
   0x3   :  { %13 = vsyncpa [#allocation10], 0 }
   0x4   :  { %14 = vsyncpa [#allocation5], 0 }
   0x5   :  { %16 = vsyncpa [#allocation5 + $0x1], 0  ;;  %s882_s15 = smov 0   ;;  %s884_s16 = smov 0  }
   0x6   :  { %s886_s17 = smov 0   ;;  %s888_s18 = smov 0  }
   0x7   :  { %s890_s19 = smov 0   ;;  %s892_s20 = smov 0  }
   0x8 LB: > { %s517_s21 = sadd.s32 4294967295, %s850_s20   ;;  %p519_p0 = scmp.ge.s32.totalorder %s850_s20, 1  ;;  %s850_s20 = sphi %s892_s20, %s22_s20   ;;  %s846_s19 = sphi %s890_s19, %s1074_s19   ;;  %s842_s18 = sphi %s888_s18, %s1073_s18   ;;  %s838_s17 = sphi %s886_s17, %s1072_s17   ;;  %s834_s16 = sphi %s884_s16, %s1071_s16   ;;  %s830_s15 = sphi %s882_s15, %s1070_s15  }
   0x9   : > { %p916_p1 = scmp.eq.s32.totalorder %s517_s21, 0  ;;  %p161_p2 = scmp.lt.s32.totalorder %s850_s20, 3 }
   0xa   : > { %s172_s25 = sshll.u32 %s1059_s1, 4  ;;  %s852_s27 = smov [#allocation6]   ;;  %s173_s25 = int_to_ptr.hbm [resolvable:$true] %s172_s25 }
   0xb   : > { %p924_p3 = pnand %p519_p0, %p161_p2  ;;  %s174_s28 = sshll.u32 %s852_s27, 4  ;;  %s175_s28 = int_to_ptr.vmem [resolvable:$true] %s174_s28 }
   0xc   : > { %p523_p6 = scmp.ge.s32.totalorder %s850_s20, 2  ;;  %s187_s6 = sshll.u32 %s1060_s2, 4  ;;  %s188_s6 = int_to_ptr.hbm [resolvable:$true] %s187_s6 }
   0xd   : > { %p554_p4 = pneg %p924_p3  ;;  %s853_s7 = smov 128  }
   0xe   : > { %s854_s8 = smov 8   ;;  %s855_s9 = smov [#allocation8]  }
   0xf   : > { %p932_p5 = pnand %p554_p4, %p916_p1  ;;  %s189_s10 = sshll.u32 %s855_s9, 4  ;;  %s190_s10 = int_to_ptr.vmem [resolvable:$true] %s189_s10 }
  0x10   : > { %s200_s13 = sshll.u32 %s1061_s3, 4  ;;  %s856_s14 = smov [#allocation9]   ;;  %s201_s13 = int_to_ptr.hbm [resolvable:$true] %s200_s13 }
  0x11   : > { %557 = dma.hbm_to_vmem [thread:$0]  (!%p932_p5), %s173_s25, 512, %s175_s28, [#allocation7], %s853_s7, %s853_s7, %s854_s8  }
  0x12   : > { %560 = dma.hbm_to_vmem [thread:$0]  (!%p932_p5), %s188_s6, 64, %s190_s10, [#allocation7]  }
  0x13   : > { %s202_s23 = sshll.u32 %s856_s14, 4  ;;  %s518_s24 = sadd.s32 4294967294, %s850_s20   ;;  %s203_s23 = int_to_ptr.vmem [resolvable:$true] %s202_s23 }
  0x14   : > { %563 = dma.hbm_to_vmem [thread:$0]  (!%p932_p5), %s201_s13, 512, %s203_s23, [#allocation10], %s853_s7, %s853_s7, %s854_s8  }
  0x15   : > { %s34_s25 = sadd.s32 1, %s846_s19  ;;  %s41_s27 = sadd.s32 1, %s838_s17 }
  0x16   : > { %p36_p7 = scmp.ge.s32.totalorder %s34_s25, 2  ;;  %p48_p8 = scmp.ne.s32.totalorder %s838_s17, %s834_s16 }
  0x17   : > { %p49_p9 = scmp.eq.s32.totalorder %s850_s20, 0  ;;  %p54_p10 = scmp.ne.s32.totalorder %s834_s16, %s830_s15 }
  0x18   : > { %s1076_s25 = smov (%p36_p7, %s34_s25), 0  ;;  %p148_p13 = scmp.eq.s32.totalorder %s517_s21, 1 }
  0x19   : > { %p959_p11 = por %p49_p9, %p48_p8  ;;  %p965_p12 = por %p916_p1, %p54_p10 }
  0x1a   : > { %s38_s30 = ssub.s32 %s846_s19, %s1076_s25  ;;  %p154_p2 = scmp.eq.s32.totalorder %s518_s24, 1 }
  0x1b   : > { %p39_p0 = scmp.eq.s32.totalorder %s38_s30, 0  ;;  %p973_p4 = por %p148_p13, %p48_p8 }
  0x1c   : > { %p575_p5 = scmp.lt.s32.totalorder %s850_s20, 2  ;;  %p981_p7 = por %p154_p2, %p54_p10 }
  0x1d   : > { %s979_s6 = scalar_select %p39_p0, %s838_s17, %s41_s27  }
  0x1e   : > { %s216_s8 = sand.u32 1, %s838_s17   ;;  %s525_s10 = sshll.u32 %s846_s19, 3 }
  0x1f   : > { %s524_s9 = sshll.u32 %s216_s8, 3  ;;  %s224_s21 = scalar_lea.hbm %s1058_s0, %s525_s10 }
  0x20   : > { %s220_s13 = scalar_lea.vmem [#allocation3], %s524_s9  ;;  %s226_s23 = sshll.u32 %s224_s21, 4  ;;  %s227_s23 = int_to_ptr.hbm [resolvable:$true] %s226_s23 }
  0x21   : > { %s228_s14 = sshll.u32 %s220_s13, 4  ;;  %p565_p8 = pnand %p575_p5, %p959_p11  ;;  %s229_s14 = int_to_ptr.vmem [resolvable:$true] %s228_s14 }
  0x22   : > { %s217_s24 = scalar_lea.sflag [#allocation4], %s216_s8  ;;  %237 = sbr.rel (%p924_p3) target bundleno = 495 (0x1ef), region = 36 }
  0x23   : > { %567 = dma.hbm_to_vmem [thread:$0]  (!%p565_p8), %s227_s23, 128, %s229_s14, %s217_s24  }
  0x24   : > { %s995_s27 = sand.u32 (!%p924_p3), 1, %s834_s16  }
  0x25   : > { %s527_s30 = sshll.u32 (!%p924_p3), %s995_s27, 3  ;;  %s240_s9 = scalar_lea.sflag (!%p924_p3), [#allocation4], %s995_s27 }
  0x26   : > { %s243_s10 = scalar_lea.vmem (!%p924_p3), [#allocation3], %s527_s30 }
  0x27   : > { %813 = dma.done.wait (%p965_p12), %s240_s9, 128  }
  0x28   : > { %815 = vsyncadd (%p965_p12), %s240_s9, 4294967168 }
  0x29   : > { %817 = dma.done.wait (%p916_p1), [#allocation7], 576  }
  0x2a   : > { %819 = vsyncadd (%p916_p1), [#allocation7], 4294966720 }
  0x2b   : > { %821 = dma.done.wait (%p916_p1), [#allocation10], 512  }
  0x2c   : > { %823 = vsyncadd (%p916_p1), [#allocation10], 4294966784  ;;  %v292_v0 = vld [vmem:[#allocation6 + $0x18] sm:$0xff]  ;;  %v291_v1 = vld [vmem:[#allocation6 + $0x10] sm:$0xff]  ;;  %vm297_vm0 = vcmask 261120   ;;  %s535_s22 = sshll.u32 %s842_s18, 3 }
  0x2d   : > { %313 = vmatpush.msra.mxu0 %v292_v0  ;;  %v290_v2 = vld [vmem:[#allocation6 + $0x8] sm:$0xff]  ;;  %v289_v3 = vld [vmem:[#allocation6] sm:$0xff]  ;;  %v288_v4 = vld [vmem:[%s243_s10] sm:$0xff]  ;;  %s402_s29 = scalar_lea.hbm %s1062_s4, %s535_s22  ;;  %s283_s8 = scalar_lea.vmem [#allocation11], %s527_s30 }
  0x2e   : > { %v633_v5 = vld [vmem:[#allocation8] ss:$0 sm:$0xff]  ;;  %v363_v26 = vld [vmem:[#allocation9 + $0x10] sm:$0xff]  ;;  %v362_v28 = vld [vmem:[#allocation9 + $0x8] sm:$0xff]  ;;  %s404_s11 = sshll.u32 %s283_s8, 4  ;;  %s406_s12 = sshll.u32 %s402_s29, 4  ;;  %s405_s11 = int_to_ptr.vmem [resolvable:$true] %s404_s11  ;;  %s407_s12 = int_to_ptr.hbm [resolvable:$true] %s406_s12 }
  0x2f   : > { %314 = vmatpush.msra.mxu0 %v291_v1  ;;  %v364_v25 = vld [vmem:[#allocation9 + $0x18] sm:$0xff]  ;;  %v361_v30 = vld [vmem:[#allocation9] sm:$0xff]  ;;  %s391_s21 = scalar_lea.sflag [#allocation5], %s995_s27  ;;  %s774_s13 = sshra.s32 %s407_s12, 4  ;;  %s775_s13 = int_to_ptr.hbm [resolvable:$true] %s774_s13 }
  0x30   : > { %381 = vmatpush.msra.mxu1 %v364_v25  ;;  %v634_v36 = vld [vmem:[#allocation8 + $0x1] ss:$0 sm:$0xff]  ;;  %v635_v39 = vld [vmem:[#allocation8 + $0x2] ss:$0 sm:$0xff]  ;;  %s776_s14 = scalar_lea.hbm %s775_s13, 8  ;;  %s780_s24 = scalar_lea.hbm %s1062_s4, 16 }
  0x31   : > { %315 = vmatpush.msra.mxu0 %v290_v2  ;;  %p777_p1 = scmp.ne.s32.totalorder %s775_s13, %s776_s14  ;;  %p781_p10 = scmp.lt.s32.totalorder %s775_s13, %s1062_s4 }
  0x32   : > { %382 = vmatpush.msra.mxu1 %v363_v26  ;;  %p782_p11 = scmp.lt.s32.totalorder %s780_s24, %s776_s14 }
  0x33   : > { %316 = vmatpush.msra.mxu0 %v289_v3  ;;  %p778_p3 = pnand %p777_p1, %p973_p4 }
  0x34   : > { %532 = vmatmul.msk.f32.vlgmr.msra.gmra.mxu0 %vm297_vm0, %v288_v4  ;;  %383 = vmatpush.msra.mxu1 %v362_v28  ;;  %p783_p12 = por %p782_p11, %p781_p10 }
  0x35   : > { %p779_p9 = pneg %p778_p3 }
  0x36   : > { %384 = vmatpush.msra.mxu1 %v361_v30 }
  0x37   : > { %p784_p13 = pnand %p783_p12, %p779_p9 }
  0xb1   : > { %v318_v6 = vpop.f32.mrf.mxu0 }
  0xb2   : > { %v319_v7 = vadd.f32 %v633_v5, %v318_v6 }
  0xb4   : > { %v322_v8 = vmul.f32 %v319_v7, %v319_v7  ;;  %v321_v14 = vmul.f32 0.5, %v319_v7 }
  0xb6   : > { %v323_v9 = vmul.f32 %v322_v8, %v319_v7 }
  0xb8   : > { %v324_v10 = vmul.f32 0.044715, %v323_v9 }
  0xba   : > { %v325_v11 = vadd.f32 %v324_v10, %v319_v7 }
  0xbc   : > { %v326_v12 = vmul.f32 0.7978846, %v325_v11 }
  0xbe   : > { %636 = vtanh.f32 %v326_v12 }
  0xc4   : > { %v637_v13 = vpop.eup %636 }
  0xc5   : > { %v328_v15 = vadd.f32 1.0, %v637_v13 }
  0xc7   : > { %v329_v16 = vmul.f32 %v328_v15, %v321_v14 }
  0xc9   : > { %v330_v17 = vsel %vm297_vm0, %v329_v16, 0.0  ;;  %v334_v18 = vmul.f32 %v329_v16, %v329_v16 }
  0xca   : > { %331 = vadd.xlane.f32.xlu0 %v330_v17 }
  0xcb   : > { %v335_v19 = vsel %vm297_vm0, %v334_v18, 0.0 }
  0xd2   : > { %336 = vadd.xlane.f32.xlu0 %v335_v19 }
 0x13d   : > { %v332_v20 = vpop.xlane.xlu0 %331 }
 0x13e   : > { %v333_v21 = vmul.f32 0.03125, %v332_v20 }
 0x140   : > { %v339_v23 = vmul.f32 %v333_v21, %v333_v21 }
 0x145   : > { %v337_v22 = vpop.xlane.xlu0 %336 }
 0x146   : > { %v338_v24 = vmul.f32 0.03125, %v337_v22 }
 0x148   : > { %v340_v27 = vsub.f32 %v338_v24, %v339_v23 }
 0x14a   : > { %v341_v29 = vadd.f32 1e-12, %v340_v27 }
 0x14c   : > { %638 = vrsqrt.f32 %v341_v29  ;;  %vm348_vm2 = vweird.f32 %v341_v29 }
 0x152   : > { %v639_v31 = vpop.eup %638 }
 0x153   : > { %v343_v32 = vmul.f32 %v639_v31, %v341_v29  ;;  %vm349_vm1 = vweird.f32 %v639_v31 }
 0x154   : > { %vm350_vm3 = vmor %vm348_vm2, %vm349_vm1 }
 0x155   : > { %v344_v33 = vmul.f32 %v639_v31, %v343_v32 }
 0x157   : > { %v345_v34 = vmul.f32 0.5, %v344_v33 }
 0x159   : > { %v346_v35 = vsub.f32 1.5, %v345_v34 }
 0x15b   : > { %v347_v37 = vmul.f32 %v639_v31, %v346_v35 }
 0x15d   : > { %v351_v38 = vsel %vm350_vm3, %v639_v31, %v347_v37 }
 0x15e   : > { %v353_v40 = vmul.f32 %v634_v36, %v351_v38 }
 0x160   : > { %v354_v41 = vmul.f32 %v353_v40, %v333_v21  ;;  %v357_v43 = vmul.f32 %v353_v40, %v329_v16 }
 0x162   : > { %v356_v42 = vsub.f32 %v635_v39, %v354_v41 }
 0x164   : > { %v358_v44 = vadd.f32 %v357_v43, %v356_v42 }
 0x166   : > { %359 = vst.msk [vmem:[#allocation2] sm:$0xff] %vm297_vm0, %v358_v44 }
 0x16d   : > { %v360_v45 = vld [vmem:[#allocation2] sm:$0xff] }
 0x16e   : > { %533 = vmatmul.msk.f32.vlgmr.msra.gmra.mxu1 %vm297_vm0, %v360_v45 }
 0x1eb   : > { %v386_v46 = vpop.f32.mrf.mxu1 }
 0x1ec   : > { %389 = vst [vmem:[%s283_s8] sm:$0xff] %v386_v46 }
 0x1ed   : > { %787 = shalt.err (!%p784_p13)
}
 0x1ee   : > { %552 = dma.vmem_to_hbm [thread:$0]  (%p973_p4), %s405_s11, 128, %s407_s12, %s391_s21  }
 0x1ef PF: > { %s418_s27 = sand.u32 1, %s830_s15   ;;  %p569_p0 = pnand %p523_p6, %p981_p7 }
 0x1f0   : > { %s419_s10 = scalar_lea.sflag [#allocation5], %s418_s27 }
 0x1f1   : > { %p570_p2 = pneg %p569_p0 }
 0x1f3   : > { %825 = dma.done.wait (%p570_p2), %s419_s10, 128  }
 0x1f4   : > { %827 = vsyncadd (%p570_p2), %s419_s10, 4294967168  ;;  %s22_s20 = sadd.s32 1, %s850_s20   ;;  %s1070_s15 = smov %s834_s16 }
 0x1f5   : > { %p19_p5 = scmp.ge.s32.totalorder %s22_s20, 4   ;;  %s1071_s16 = smov %s838_s17 }
 0x1f6   : > { %s1072_s17 = smov %s979_s6  ;;  %s1073_s18 = smov %s846_s19 }
 0x1f7   : > { %s1074_s19 = smov %s1076_s25  ;;  %21 = sbr.rel (!%p19_p5) target bundleno = 8 (0x8), region = 98 }
 0x1fc   :  { %425 = vsyncpa [#allocation4], 1 }
 0x1fd   :  { %427 = vsyncpa [#allocation4 + $0x1], 1 }
 0x1fe   :  { %428 = vsyncpa [#allocation7], 1 }
 0x1ff   :  { %429 = vsyncpa [#allocation10], 1 }
 0x200   :  { %430 = vsyncpa [#allocation5], 1 }
 0x201   :  { %432 = vsyncpa [#allocation5 + $0x1], 1 }

// kernel: tpu_custom_call.1
= control target key start
LH: loop header
LB: loop body
LE: loop exit
PB: predicated region body
PF: predicated region fallthrough
CT: control target
= control target key end

     0   :  { %9 = vsyncpa [#allocation4], 0  ;;  %s1058_s0 = inlined_call_operand.hbm [shape: f32[16,32], index: 0, kind: input, shape index: {}]   ;;  %s1059_s1 = inlined_call_operand.hbm [shape: f32[32,32], index: 1, kind: input, shape index: {}]   ;;  %s1060_s2 = inlined_call_operand.hbm [shape: f32[3,32], index: 2, kind: input, shape index: {}]   ;;  %s1061_s3 = inlined_call_operand.hbm [shape: f32[32,128], index: 3, kind: input, shape index: {}]   ;;  %s1062_s4 = inlined_call_operand.hbm [shape: f32[16,128], index: 4, kind: output, shape index: {}]  }
   0x1   :  { %11 = vsyncpa [#allocation4 + $0x1], 0 }
   0x2   :  { %12 = vsyncpa [#allocation7], 0 }
   0x3   :  { %13 = vsyncpa [#allocation10], 0 }
   0x4   :  { %14 = vsyncpa [#allocation5], 0 }
   0x5   :  { %16 = vsyncpa [#allocation5 + $0x1], 0  ;;  %s882_s15 = smov 0   ;;  %s884_s16 = smov 0  }
   0x6   :  { %s886_s17 = smov 0   ;;  %s888_s18 = smov 0  }
   0x7   :  { %s890_s19 = smov 0   ;;  %s892_s20 = smov 0  }
   0x8 LB: > { %s517_s21 = sadd.s32 4294967295, %s850_s20   ;;  %p519_p0 = scmp.ge.s32.totalorder %s850_s20, 1  ;;  %s850_s20 = sphi %s892_s20, %s22_s20   ;;  %s846_s19 = sphi %s890_s19, %s1074_s19   ;;  %s842_s18 = sphi %s888_s18, %s1073_s18   ;;  %s838_s17 = sphi %s886_s17, %s1072_s17   ;;  %s834_s16 = sphi %s884_s16, %s1071_s16   ;;  %s830_s15 = sphi %s882_s15, %s1070_s15  }
   0x9   : > { %p916_p1 = scmp.eq.s32.totalorder %s517_s21, 0  ;;  %p161_p2 = scmp.lt.s32.totalorder %s850_s20, 3 }
   0xa   : > { %s172_s25 = sshll.u32 %s1059_s1, 4  ;;  %s852_s27 = smov [#allocation6]   ;;  %s173_s25 = int_to_ptr.hbm [resolvable:$true] %s172_s25 }
   0xb   : > { %p924_p3 = pnand %p519_p0, %p161_p2  ;;  %s174_s28 = sshll.u32 %s852_s27, 4  ;;  %s175_s28 = int_to_ptr.vmem [resolvable:$true] %s174_s28 }
   0xc   : > { %p523_p6 = scmp.ge.s32.totalorder %s850_s20, 2  ;;  %s187_s6 = sshll.u32 %s1060_s2, 4  ;;  %s188_s6 = int_to_ptr.hbm [resolvable:$true] %s187_s6 }
   0xd   : > { %p554_p4 = pneg %p924_p3  ;;  %s853_s7 = smov 128  }
   0xe   : > { %s854_s8 = smov 8   ;;  %s855_s9 = smov [#allocation8]  }
   0xf   : > { %p932_p5 = pnand %p554_p4, %p916_p1  ;;  %s189_s10 = sshll.u32 %s855_s9, 4  ;;  %s190_s10 = int_to_ptr.vmem [resolvable:$true] %s189_s10 }
  0x10   : > { %s200_s13 = sshll.u32 %s1061_s3, 4  ;;  %s856_s14 = smov [#allocation9]   ;;  %s201_s13 = int_to_ptr.hbm [resolvable:$true] %s200_s13 }
  0x11   : > { %557 = dma.hbm_to_vmem [thread:$0]  (!%p932_p5), %s173_s25, 512, %s175_s28, [#allocation7], %s853_s7, %s853_s7, %s854_s8  }
  0x12   : > { %560 = dma.hbm_to_vmem [thread:$0]  (!%p932_p5), %s188_s6, 64, %s190_s10, [#allocation7]  }
  0x13   : > { %s202_s23 = sshll.u32 %s856_s14, 4  ;;  %s518_s24 = sadd.s32 4294967294, %s850_s20   ;;  %s203_s23 = int_to_ptr.vmem [resolvable:$true] %s202_s23 }
  0x14   : > { %563 = dma.hbm_to_vmem [thread:$0]  (!%p932_p5), %s201_s13, 512, %s203_s23, [#allocation10], %s853_s7, %s853_s7, %s854_s8  }
  0x15   : > { %s34_s25 = sadd.s32 1, %s846_s19  ;;  %s41_s27 = sadd.s32 1, %s838_s17 }
  0x16   : > { %p36_p7 = scmp.ge.s32.totalorder %s34_s25, 2  ;;  %p48_p8 = scmp.ne.s32.totalorder %s838_s17, %s834_s16 }
  0x17   : > { %p49_p9 = scmp.eq.s32.totalorder %s850_s20, 0  ;;  %p54_p10 = scmp.ne.s32.totalorder %s834_s16, %s830_s15 }
  0x18   : > { %s1076_s25 = smov (%p36_p7, %s34_s25), 0  ;;  %p148_p13 = scmp.eq.s32.totalorder %s517_s21, 1 }
  0x19   : > { %p959_p11 = por %p49_p9, %p48_p8  ;;  %p965_p12 = por %p916_p1, %p54_p10 }
  0x1a   : > { %s38_s30 = ssub.s32 %s846_s19, %s1076_s25  ;;  %p154_p2 = scmp.eq.s32.totalorder %s518_s24, 1 }
  0x1b   : > { %p39_p0 = scmp.eq.s32.totalorder %s38_s30, 0  ;;  %p973_p4 = por %p148_p13, %p48_p8 }
  0x1c   : > { %p575_p5 = scmp.lt.s32.totalorder %s850_s20, 2  ;;  %p981_p7 = por %p154_p2, %p54_p10 }
  0x1d   : > { %s979_s6 = scalar_select %p39_p0, %s838_s17, %s41_s27  }
  0x1e   : > { %s216_s8 = sand.u32 1, %s838_s17   ;;  %s525_s10 = sshll.u32 %s846_s19, 3 }
  0x1f   : > { %s524_s9 = sshll.u32 %s216_s8, 3  ;;  %s224_s21 = scalar_lea.hbm %s1058_s0, %s525_s10 }
  0x20   : > { %s220_s13 = scalar_lea.vmem [#allocation3], %s524_s9  ;;  %s226_s23 = sshll.u32 %s224_s21, 4  ;;  %s227_s23 = int_to_ptr.hbm [resolvable:$true] %s226_s23 }
  0x21   : > { %s228_s14 = sshll.u32 %s220_s13, 4  ;;  %p565_p8 = pnand %p575_p5, %p959_p11  ;;  %s229_s14 = int_to_ptr.vmem [resolvable:$true] %s228_s14 }
  0x22   : > { %s217_s24 = scalar_lea.sflag [#allocation4], %s216_s8  ;;  %237 = sbr.rel (%p924_p3) target bundleno = 495 (0x1ef), region = 36 }
  0x23   : > { %567 = dma.hbm_to_vmem [thread:$0]  (!%p565_p8), %s227_s23, 128, %s229_s14, %s217_s24  }
  0x24   : > { %s995_s27 = sand.u32 (!%p924_p3), 1, %s834_s16  }
  0x25   : > { %s527_s30 = sshll.u32 (!%p924_p3), %s995_s27, 3  ;;  %s240_s9 = scalar_lea.sflag (!%p924_p3), [#allocation4], %s995_s27 }
  0x26   : > { %s243_s10 = scalar_lea.vmem (!%p924_p3), [#allocation3], %s527_s30 }
  0x27   : > { %813 = dma.done.wait (%p965_p12), %s240_s9, 128  }
  0x28   : > { %815 = vsyncadd (%p965_p12), %s240_s9, 4294967168 }
  0x29   : > { %817 = dma.done.wait (%p916_p1), [#allocation7], 576  }
  0x2a   : > { %819 = vsyncadd (%p916_p1), [#allocation7], 4294966720 }
  0x2b   : > { %821 = dma.done.wait (%p916_p1), [#allocation10], 512  }
  0x2c   : > { %823 = vsyncadd (%p916_p1), [#allocation10], 4294966784  ;;  %v292_v0 = vld [vmem:[#allocation6 + $0x18] sm:$0xff]  ;;  %v291_v1 = vld [vmem:[#allocation6 + $0x10] sm:$0xff]  ;;  %vm297_vm0 = vcmask 261120   ;;  %s535_s22 = sshll.u32 %s842_s18, 3 }
  0x2d   : > { %313 = vmatpush.msra.mxu0 %v292_v0  ;;  %v290_v2 = vld [vmem:[#allocation6 + $0x8] sm:$0xff]  ;;  %v289_v3 = vld [vmem:[#allocation6] sm:$0xff]  ;;  %v288_v4 = vld [vmem:[%s243_s10] sm:$0xff]  ;;  %s402_s29 = scalar_lea.hbm %s1062_s4, %s535_s22  ;;  %s283_s8 = scalar_lea.vmem [#allocation11], %s527_s30 }
  0x2e   : > { %v633_v5 = vld [vmem:[#allocation8] ss:$0 sm:$0xff]  ;;  %v363_v26 = vld [vmem:[#allocation9 + $0x10] sm:$0xff]  ;;  %v362_v28 = vld [vmem:[#allocation9 + $0x8] sm:$0xff]  ;;  %s404_s11 = sshll.u32 %s283_s8, 4  ;;  %s406_s12 = sshll.u32 %s402_s29, 4  ;;  %s405_s11 = int_to_ptr.vmem [resolvable:$true] %s404_s11  ;;  %s407_s12 = int_to_ptr.hbm [resolvable:$true] %s406_s12 }
  0x2f   : > { %314 = vmatpush.msra.mxu0 %v291_v1  ;;  %v364_v25 = vld [vmem:[#allocation9 + $0x18] sm:$0xff]  ;;  %v361_v30 = vld [vmem:[#allocation9] sm:$0xff]  ;;  %s391_s21 = scalar_lea.sflag [#allocation5], %s995_s27  ;;  %s774_s13 = sshra.s32 %s407_s12, 4  ;;  %s775_s13 = int_to_ptr.hbm [resolvable:$true] %s774_s13 }
  0x30   : > { %381 = vmatpush.msra.mxu1 %v364_v25  ;;  %v634_v36 = vld [vmem:[#allocation8 + $0x1] ss:$0 sm:$0xff]  ;;  %v635_v39 = vld [vmem:[#allocation8 + $0x2] ss:$0 sm:$0xff]  ;;  %s776_s14 = scalar_lea.hbm %s775_s13, 8  ;;  %s780_s24 = scalar_lea.hbm %s1062_s4, 16 }
  0x31   : > { %315 = vmatpush.msra.mxu0 %v290_v2  ;;  %p777_p1 = scmp.ne.s32.totalorder %s775_s13, %s776_s14  ;;  %p781_p10 = scmp.lt.s32.totalorder %s775_s13, %s1062_s4 }
  0x32   : > { %382 = vmatpush.msra.mxu1 %v363_v26  ;;  %p782_p11 = scmp.lt.s32.totalorder %s780_s24, %s776_s14 }
  0x33   : > { %316 = vmatpush.msra.mxu0 %v289_v3  ;;  %p778_p3 = pnand %p777_p1, %p973_p4 }
  0x34   : > { %532 = vmatmul.msk.f32.vlgmr.msra.gmra.mxu0 %vm297_vm0, %v288_v4  ;;  %383 = vmatpush.msra.mxu1 %v362_v28  ;;  %p783_p12 = por %p782_p11, %p781_p10 }
  0x35   : > { %p779_p9 = pneg %p778_p3 }
  0x36   : > { %384 = vmatpush.msra.mxu1 %v361_v30 }
  0x37   : > { %p784_p13 = pnand %p783_p12, %p779_p9 }
  0xb1   : > { %v318_v6 = vpop.f32.mrf.mxu0 }
  0xb2   : > { %v319_v7 = vadd.f32 %v633_v5, %v318_v6 }
  0xb4   : > { %v322_v8 = vmul.f32 %v319_v7, %v319_v7  ;;  %v321_v14 = vmul.f32 0.5, %v319_v7 }
  0xb6   : > { %v323_v9 = vmul.f32 %v322_v8, %v319_v7 }
  0xb8   : > { %v324_v10 = vmul.f32 0.044715, %v323_v9 }
  0xba   : > { %v325_v11 = vadd.f32 %v324_v10, %v319_v7 }
  0xbc   : > { %v326_v12 = vmul.f32 0.7978846, %v325_v11 }
  0xbe   : > { %636 = vtanh.f32 %v326_v12 }
  0xc4   : > { %v637_v13 = vpop.eup %636 }
  0xc5   : > { %v328_v15 = vadd.f32 1.0, %v637_v13 }
  0xc7   : > { %v329_v16 = vmul.f32 %v328_v15, %v321_v14 }
  0xc9   : > { %v330_v17 = vsel %vm297_vm0, %v329_v16, 0.0  ;;  %v334_v18 = vmul.f32 %v329_v16, %v329_v16 }
  0xca   : > { %331 = vadd.xlane.f32.xlu0 %v330_v17 }
  0xcb   : > { %v335_v19 = vsel %vm297_vm0, %v334_v18, 0.0 }
  0xd2   : > { %336 = vadd.xlane.f32.xlu0 %v335_v19 }
 0x13d   : > { %v332_v20 = vpop.xlane.xlu0 %331 }
 0x13e   : > { %v333_v21 = vmul.f32 0.03125, %v332_v20 }
 0x140   : > { %v339_v23 = vmul.f32 %v333_v21, %v333_v21 }
 0x145   : > { %v337_v22 = vpop.xlane.xlu0 %336 }
 0x146   : > { %v338_v24 = vmul.f32 0.03125, %v337_v22 }
 0x148   : > { %v340_v27 = vsub.f32 %v338_v24, %v339_v23 }
 0x14a   : > { %v341_v29 = vadd.f32 1e-12, %v340_v27 }
 0x14c   : > { %638 = vrsqrt.f32 %v341_v29  ;;  %vm348_vm2 = vweird.f32 %v341_v29 }
 0x152   : > { %v639_v31 = vpop.eup %638 }
 0x153   : > { %v343_v32 = vmul.f32 %v639_v31, %v341_v29  ;;  %vm349_vm1 = vweird.f32 %v639_v31 }
 0x154   : > { %vm350_vm3 = vmor %vm348_vm2, %vm349_vm1 }
 0x155   : > { %v344_v33 = vmul.f32 %v639_v31, %v343_v32 }
 0x157   : > { %v345_v34 = vmul.f32 0.5, %v344_v33 }
 0x159   : > { %v346_v35 = vsub.f32 1.5, %v345_v34 }
 0x15b   : > { %v347_v37 = vmul.f32 %v639_v31, %v346_v35 }
 0x15d   : > { %v351_v38 = vsel %vm350_vm3, %v639_v31, %v347_v37 }
 0x15e   : > { %v353_v40 = vmul.f32 %v634_v36, %v351_v38 }
 0x160   : > { %v354_v41 = vmul.f32 %v353_v40, %v333_v21  ;;  %v357_v43 = vmul.f32 %v353_v40, %v329_v16 }
 0x162   : > { %v356_v42 = vsub.f32 %v635_v39, %v354_v41 }
 0x164   : > { %v358_v44 = vadd.f32 %v357_v43, %v356_v42 }
 0x166   : > { %359 = vst.msk [vmem:[#allocation2] sm:$0xff] %vm297_vm0, %v358_v44 }
 0x16d   : > { %v360_v45 = vld [vmem:[#allocation2] sm:$0xff] }
 0x16e   : > { %533 = vmatmul.msk.f32.vlgmr.msra.gmra.mxu1 %vm297_vm0, %v360_v45 }
 0x1eb   : > { %v386_v46 = vpop.f32.mrf.mxu1 }
 0x1ec   : > { %389 = vst [vmem:[%s283_s8] sm:$0xff] %v386_v46 }
 0x1ed   : > { %787 = shalt.err (!%p784_p13)
}
 0x1ee   : > { %552 = dma.vmem_to_hbm [thread:$0]  (%p973_p4), %s405_s11, 128, %s407_s12, %s391_s21  }
 0x1ef PF: > { %s418_s27 = sand.u32 1, %s830_s15   ;;  %p569_p0 = pnand %p523_p6, %p981_p7 }
 0x1f0   : > { %s419_s10 = scalar_lea.sflag [#allocation5], %s418_s27 }
 0x1f1   : > { %p570_p2 = pneg %p569_p0 }
 0x1f3   : > { %825 = dma.done.wait (%p570_p2), %s419_s10, 128  }
 0x1f4   : > { %827 = vsyncadd (%p570_p2), %s419_s10, 4294967168  ;;  %s22_s20 = sadd.s32 1, %s850_s20   ;;  %s1070_s15 = smov %s834_s16 }
 0x1f5   : > { %p19_p5 = scmp.ge.s32.totalorder %s22_s20, 4   ;;  %s1071_s16 = smov %s838_s17 }
 0x1f6   : > { %s1072_s17 = smov %s979_s6  ;;  %s1073_s18 = smov %s846_s19 }
 0x1f7   : > { %s1074_s19 = smov %s1076_s25  ;;  %21 = sbr.rel (!%p19_p5) target bundleno = 8 (0x8), region = 98 }
 0x1fc   :  { %425 = vsyncpa [#allocation4], 1 }
 0x1fd   :  { %427 = vsyncpa [#allocation4 + $0x1], 1 }
 0x1fe   :  { %428 = vsyncpa [#allocation7], 1 }
 0x1ff   :  { %429 = vsyncpa [#allocation10], 1 }
 0x200   :  { %430 = vsyncpa [#allocation5], 1 }
 0x201   :  { %432 = vsyncpa [#allocation5 + $0x1], 1 }

</bundles_post_ra>
